<compile_context>
chip_gen: v5e
topology: v5e:2x2
jax: 0.10.0
libtpu: 0.0.40
codegen_flags: <defaults>
</compile_context>

<pallas_src>
import numpy as np
import jax
import jax.numpy as jnp
from jax.experimental import pallas as pl
from jax.experimental.pallas import tpu as pltpu


def _round_up(x, m):
    return ((x + m - 1) // m) * m


def _vmem_limit_bytes():
    """~75% of physical VMEM, capped at 96 MiB.
    v5e/v6e (128 MiB phys) -> 96 MiB; v7x (64 MiB phys) -> 48 MiB;
    unknown -> 48 MiB (safe everywhere)."""
    cap = 64 * 1024 * 1024
    try:
        info = pltpu.get_tpu_info()
        cap = int(getattr(info, "vmem_capacity_bytes", cap))
    except Exception:
        pass
    return int(min(cap * 3 // 4, 96 * 1024 * 1024))


def _pick_row_tile(n_pad):
    """Row tile for the propagate passes.  Prefer >=2 (ideally an even number
    of) row tiles so v7x's two TensorCores both get work on the parallel axis."""
    if n_pad <= 128:
        return 128
    for t in (512, 256, 128):
        if n_pad % t == 0 and (n_pad // t) >= 2 and (n_pad // t) % 2 == 0:
            return t
    for t in (512, 256, 128):
        if n_pad % t == 0 and (n_pad // t) >= 2:
            return t
    return 128


def _pick_col_tile(n_pad):
    for t in (512, 256, 128):
        if n_pad % t == 0:
            return t
    return 128


def _features_fit_vmem(n_pad, h_pad, tm, tk, g_pad, vmem_limit):
    """Can the projected features stay fully VMEM-resident in the propagate pass?"""
    a_bufs = 2 * tm * tk * 2                 # double-buffered A tiles (bf16)
    feat_res = 2 * n_pad * h_pad * 2         # resident projected features (bf16)
    w2_res = 2 * h_pad * h_pad * 2           # resident W2 (layer-1 epilogue)
    acc = tm * h_pad * 4                     # f32 accumulator scratch
    out_bufs = 2 * max(tm * h_pad * 2, g_pad * h_pad * 4)
    pool_bufs = 2 * g_pad * tm * 2
    misc = 2 * 1024 * 1024
    total = a_bufs + feat_res + w2_res + acc + out_bufs + pool_bufs + misc
    return total <= int(vmem_limit * 0.8)


def _build_tile_map(a_np, n_pad, tm, tk):
    """Host-side block-sparsity map: per row tile, the list of non-zero (tm, tk)
    column tiles of A_hat.  Padded slots repeat the last valid index so the
    Pallas pipeline issues no extra DMA for them (block index unchanged)."""
    row_tiles, col_tiles = n_pad // tm, n_pad // tk
    n = a_np.shape[0]
    nz = np.zeros((row_tiles, col_tiles), dtype=bool)
    for i in range(row_tiles):
        r0, r1 = i * tm, min((i + 1) * tm, n)
        if r0 >= n:
            continue
        for j in range(col_tiles):
            c0, c1 = j * tk, min((j + 1) * tk, n)
            if c0 >= n:
                continue
            nz[i, j] = bool(np.any(a_np[r0:r1, c0:c1] != 0.0))
    cnt = nz.sum(axis=1).astype(np.int32)
    max_nnz = max(int(cnt.max()), 1) if cnt.size else 1
    idx = np.zeros((row_tiles, max_nnz), dtype=np.int32)
    for i in range(row_tiles):
        ks = np.nonzero(nz[i])[0]
        if ks.size:
            idx[i, :ks.size] = ks
            idx[i, ks.size:] = ks[-1]
    return jnp.asarray(cnt), jnp.asarray(idx), int(cnt.sum())


# --------------------------------------------------------------------------
# Projection kernel:  XW1 = X @ W1   (bf16 in, f32 accumulate, bf16 out)
# --------------------------------------------------------------------------
def _proj_kernel(x_ref, w_ref, o_ref):
    o_ref[...] = jnp.dot(x_ref[...], w_ref[...],
                         preferred_element_type=jnp.float32).astype(o_ref.dtype)


def _project(x, w, tm, vmem_limit):
    n_pad, f_pad = x.shape
    h_pad = w.shape[1]
    return pl.pallas_call(
        _proj_kernel,
        out_shape=jax.ShapeDtypeStruct((n_pad, h_pad), jnp.bfloat16),
        grid_spec=pltpu.PrefetchScalarGridSpec(
            num_scalar_prefetch=0,
            grid=(n_pad // tm,),
            in_specs=[pl.BlockSpec((tm, f_pad), lambda i: (i, 0)),
                      pl.BlockSpec((f_pad, h_pad), lambda i: (0, 0))],   # resident
            out_specs=pl.BlockSpec((tm, h_pad), lambda i: (i, 0)),
        ),
        compiler_params=pltpu.CompilerParams(
            dimension_semantics=("parallel",),
            vmem_limit_bytes=vmem_limit),
        cost_estimate=pl.CostEstimate(
            flops=2 * n_pad * f_pad * h_pad,
            transcendentals=0,
            bytes_accessed=2 * (n_pad * f_pad + f_pad * h_pad + n_pad * h_pad)),
    )(x, w)


# --------------------------------------------------------------------------
# Layer 1: HW2 = relu(A_hat @ XW1 + b1) @ W2   (block-sparse A, fused projection)
# Grid: (row tiles [parallel], non-zero k-tile slots [arbitrary])
# --------------------------------------------------------------------------
def _make_layer1_kernel(tk, feat_resident):
    def kernel(cnt_ref, idx_ref, a_ref, xw_ref, w2_ref, b1_ref, o_ref, acc_ref):
        i = pl.program_id(0)
        j = pl.program_id(1)

        @pl.when(j == 0)
        def _():
            acc_ref[...] = jnp.zeros_like(acc_ref)

        # Only the first cnt[i] slots carry real (non-zero) A tiles.
        @pl.when(j < cnt_ref[i])
        def _():
            if feat_resident:
                start = pl.multiple_of(idx_ref[i, j] * tk, tk)
                xw = xw_ref[pl.ds(start, tk), :]
            else:
                xw = xw_ref[...]
            acc_ref[...] += jnp.dot(a_ref[...], xw,
                                    preferred_element_type=jnp.float32)

        @pl.when(j == pl.num_programs(1) - 1)
        def _():
            h1 = jnp.maximum(acc_ref[...] + b1_ref[...], 0.0)      # f32 epilogue
            # Fused layer-2 projection: emit h1 @ W2 directly so h1 never
            # round-trips through HBM and no separate projection pass is needed.
            o_ref[...] = jnp.dot(h1.astype(jnp.bfloat16), w2_ref[...],
                                 preferred_element_type=jnp.float32
                                 ).astype(o_ref.dtype)
    return kernel


def _layer1(tile_cnt, tile_idx, a, xw1, w2, b1, tm, tk, feat_resident,
            vmem_limit, nnz_tiles):
    n_pad = a.shape[0]
    h_pad = xw1.shape[1]
    row_tiles = n_pad // tm
    max_nnz = tile_idx.shape[1]
    if feat_resident:
        xw_spec = pl.BlockSpec((n_pad, h_pad), lambda i, j, c, t: (0, 0))
    else:
        xw_spec = pl.BlockSpec((tk, h_pad), lambda i, j, c, t: (t[i, j], 0))
    return pl.pallas_call(
        _make_layer1_kernel(tk, feat_resident),
        out_shape=jax.ShapeDtypeStruct((n_pad, h_pad), jnp.bfloat16),
        grid_spec=pltpu.PrefetchScalarGridSpec(
            num_scalar_prefetch=2,
            grid=(row_tiles, max_nnz),
            in_specs=[pl.BlockSpec((tm, tk), lambda i, j, c, t: (i, t[i, j])),
                      xw_spec,
                      pl.BlockSpec((h_pad, h_pad), lambda i, j, c, t: (0, 0)),
                      pl.BlockSpec((1, h_pad), lambda i, j, c, t: (0, 0))],
            out_specs=pl.BlockSpec((tm, h_pad), lambda i, j, c, t: (i, 0)),
            scratch_shapes=[pltpu.VMEM((tm, h_pad), jnp.float32)],
        ),
        compiler_params=pltpu.CompilerParams(
            dimension_semantics=("parallel", "arbitrary"),
            vmem_limit_bytes=vmem_limit),
        cost_estimate=pl.CostEstimate(
            flops=2 * (nnz_tiles * tm * tk * h_pad + n_pad * h_pad * h_pad),
            transcendentals=0,
            bytes_accessed=2 * (nnz_tiles * tm * tk + 2 * n_pad * h_pad
                                + h_pad * h_pad) + 4 * h_pad),
    )(tile_cnt, tile_idx, a, xw1, w2, b1)


# --------------------------------------------------------------------------
# Layer 2 + pooling: g_partial[i] = pool_i @ (A_hat_i @ HW2 + b2)
# (block-sparse A, h2 never materialized in HBM; per-row-tile pooled partials
#  keep the parallel row axis megacore-safe on v7x)
# --------------------------------------------------------------------------
def _make_layer2_kernel(tk, feat_resident):
    def kernel(cnt_ref, idx_ref, a_ref, hw_ref, b2_ref, pool_ref, o_ref, acc_ref):
        i = pl.program_id(0)
        j = pl.program_id(1)

        @pl.when(j == 0)
        def _():
            acc_ref[...] = jnp.zeros_like(acc_ref)

        @pl.when(j < cnt_ref[i])
        def _():
            if feat_resident:
                start = pl.multiple_of(idx_ref[i, j] * tk, tk)
                hw = hw_ref[pl.ds(start, tk), :]
            else:
                hw = hw_ref[...]
            acc_ref[...] += jnp.dot(a_ref[...], hw,
                                    preferred_element_type=jnp.float32)

        @pl.when(j == pl.num_programs(1) - 1)
        def _():
            h2 = (acc_ref[...] + b2_ref[...]).astype(jnp.bfloat16)
            # Fused global_mean_pool.  Pool mask columns for padded node rows
            # are zero, so the b2 garbage in padded rows never enters the mean.
            o_ref[...] = jnp.dot(pool_ref[...], h2,
                                 preferred_element_type=jnp.float32)[None]
    return kernel


def _layer2(tile_cnt, tile_idx, a, hw2, b2, pool, tm, tk, feat_resident,
            vmem_limit, nnz_tiles):
    n_pad = a.shape[0]
    h_pad = hw2.shape[1]
    g_pad = pool.shape[0]
    row_tiles = n_pad // tm
    max_nnz = tile_idx.shape[1]
    if feat_resident:
        hw_spec = pl.BlockSpec((n_pad, h_pad), lambda i, j, c, t: (0, 0))
    else:
        hw_spec = pl.BlockSpec((tk, h_pad), lambda i, j, c, t: (t[i, j], 0))
    return pl.pallas_call(
        _make_layer2_kernel(tk, feat_resident),
        out_shape=jax.ShapeDtypeStruct((row_tiles, g_pad, h_pad), jnp.float32),
        grid_spec=pltpu.PrefetchScalarGridSpec(
            num_scalar_prefetch=2,
            grid=(row_tiles, max_nnz),
            in_specs=[pl.BlockSpec((tm, tk), lambda i, j, c, t: (i, t[i, j])),
                      hw_spec,
                      pl.BlockSpec((1, h_pad), lambda i, j, c, t: (0, 0)),
                      pl.BlockSpec((g_pad, tm), lambda i, j, c, t: (0, i))],
            out_specs=pl.BlockSpec((1, g_pad, h_pad), lambda i, j, c, t: (i, 0, 0)),
            scratch_shapes=[pltpu.VMEM((tm, h_pad), jnp.float32)],
        ),
        compiler_params=pltpu.CompilerParams(
            dimension_semantics=("parallel", "arbitrary"),
            vmem_limit_bytes=vmem_limit),
        cost_estimate=pl.CostEstimate(
            flops=2 * (nnz_tiles * tm * tk * h_pad + n_pad * g_pad * h_pad),
            transcendentals=0,
            bytes_accessed=(2 * (nnz_tiles * tm * tk + n_pad * h_pad + g_pad * n_pad)
                            + 4 * row_tiles * g_pad * h_pad)),
    )(tile_cnt, tile_idx, a, hw2, b2, pool)


# --------------------------------------------------------------------------
# Final reduce + classifier: g = (sum_i g_partial[i]) * 1/count;
#                            out = relu(g @ W3 + b3) @ W4 + b4
# --------------------------------------------------------------------------
def _classifier_kernel(gp_ref, invc_ref, w3_ref, b3_ref, w4_ref, b4_ref, out_ref):
    g = jnp.sum(gp_ref[...], axis=0) * invc_ref[...]          # exact per-graph mean
    z = jnp.maximum(jnp.dot(g, w3_ref[...],
                            preferred_element_type=jnp.float32) + b3_ref[...], 0.0)
    out_ref[...] = (jnp.dot(z, w4_ref[...],
                            preferred_element_type=jnp.float32) + b4_ref[...])


def _classify(g_partial, invc, w3, b3, w4, b4, vmem_limit):
    row_tiles, g_pad, h_pad = g_partial.shape
    half_pad = w3.shape[1]
    out_pad = w4.shape[1]
    return pl.pallas_call(
        _classifier_kernel,
        out_shape=jax.ShapeDtypeStruct((g_pad, out_pad), jnp.float32),
        grid_spec=pltpu.PrefetchScalarGridSpec(
            num_scalar_prefetch=0,
            grid=(1,),
            in_specs=[pl.BlockSpec((row_tiles, g_pad, h_pad), lambda i: (0, 0, 0)),
                      pl.BlockSpec((g_pad, 1), lambda i: (0, 0)),
                      pl.BlockSpec((h_pad, half_pad), lambda i: (0, 0)),
                      pl.BlockSpec((1, half_pad), lambda i: (0, 0)),
                      pl.BlockSpec((half_pad, out_pad), lambda i: (0, 0)),
                      pl.BlockSpec((1, out_pad), lambda i: (0, 0))],
            out_specs=pl.BlockSpec((g_pad, out_pad), lambda i: (0, 0)),
        ),
        compiler_params=pltpu.CompilerParams(
            dimension_semantics=("arbitrary",),
            vmem_limit_bytes=vmem_limit),
    )(g_partial, invc, w3, b3, w4, b4)


# --------------------------------------------------------------------------
# Full forward wrapper (pads, casts, builds the tile-sparsity map, runs passes)
# --------------------------------------------------------------------------
def image_gcn_forward(a_hat, x, params, pool_mask, counts):
    w1, b1, w2, b2, w3, b3, w4, b4 = params
    n, f = x.shape
    h = w1.shape[1]
    half = w3.shape[1]
    out_dim = w4.shape[1]
    g = pool_mask.shape[0]

    n_pad = _round_up(n, 128)
    f_pad = _round_up(f, 128)
    h_pad = _round_up(h, 128)
    half_pad = _round_up(half, 128)
    out_pad = _round_up(out_dim, 128)
    g_pad = _round_up(g, 8)
    tm = _pick_row_tile(n_pad)
    tk = _pick_col_tile(n_pad)
    vmem_limit = _vmem_limit_bytes()
    feat_resident = _features_fit_vmem(n_pad, h_pad, tm, tk, g_pad, vmem_limit)

    # Host-side block-sparsity map of A_hat (per-row-tile non-zero k tiles).
    a_np = np.asarray(a_hat, dtype=np.float32)
    tile_cnt, tile_idx, nnz_tiles = _build_tile_map(a_np, n_pad, tm, tk)

    def pad2(arr, rows, cols, dtype):
        arr = jnp.asarray(arr, dtype)
        return jnp.pad(arr, ((0, rows - arr.shape[0]), (0, cols - arr.shape[1])))

    a_bf = pad2(a_hat, n_pad, n_pad, jnp.bfloat16)        # A_hat in [0,1] -> bf16 safe
    x_bf = pad2(x, n_pad, f_pad, jnp.bfloat16)
    w1_bf = pad2(w1, f_pad, h_pad, jnp.bfloat16)
    w2_bf = pad2(w2, h_pad, h_pad, jnp.bfloat16)
    b1_p = pad2(b1, 1, h_pad, jnp.float32)
    b2_p = pad2(b2, 1, h_pad, jnp.float32)
    w3_p = pad2(w3, h_pad, half_pad, jnp.float32)
    b3_p = pad2(b3, 1, half_pad, jnp.float32)
    w4_p = pad2(w4, half_pad, out_pad, jnp.float32)
    b4_p = pad2(b4, 1, out_pad, jnp.float32)
    pool_bf = pad2(pool_mask, g_pad, n_pad, jnp.bfloat16)  # 0/1 mask: exact in bf16
    invc = jnp.zeros((g_pad, 1), jnp.float32).at[:g, 0].set(
        1.0 / jnp.maximum(jnp.asarray(counts, jnp.float32), 1.0))

    xw1 = _project(x_bf, w1_bf, tm, vmem_limit)                      # x @ W1
    hw2 = _layer1(tile_cnt, tile_idx, a_bf, xw1, w2_bf, b1_p, tm, tk,
                  feat_resident, vmem_limit, nnz_tiles)              # relu(A@xw1+b1)@W2
    g_partial = _layer2(tile_cnt, tile_idx, a_bf, hw2, b2_p, pool_bf, tm, tk,
                        feat_resident, vmem_limit, nnz_tiles)        # pool_i @ (A_i@hw2+b2)
    out = _classify(g_partial, invc, w3_p, b3_p, w4_p, b4_p, vmem_limit)
    return out[:g, :out_dim]


# --------------------------------------------------------------------------
# Host-side graph preprocessing + params
# --------------------------------------------------------------------------
def build_normalized_adjacency(edge_index, num_nodes):
    """Dense A_hat = D^{-1/2} (A + I) D^{-1/2}, matching PyG GCNConv defaults."""
    a = np.zeros((num_nodes, num_nodes), dtype=np.float32)
    src, dst = np.asarray(edge_index)
    a[dst, src] = 1.0
    a = a + np.eye(num_nodes, dtype=np.float32)
    deg = a.sum(axis=1)
    d_inv_sqrt = np.where(deg > 0, deg ** -0.5, 0.0).astype(np.float32)
    return (d_inv_sqrt[:, None] * a) * d_inv_sqrt[None, :]


def build_pool_mask(batch, num_graphs):
    """0/1 membership mask [G, N] plus per-graph node counts."""
    batch = np.asarray(batch)
    n = batch.shape[0]
    mask = np.zeros((num_graphs, n), dtype=np.float32)
    counts = np.zeros((num_graphs,), dtype=np.float32)
    for gi in range(num_graphs):
        idx = np.where(batch == gi)[0]
        mask[gi, idx] = 1.0
        counts[gi] = max(len(idx), 1)
    return mask, counts


def init_params(key, input_dim, hidden_dim, output_dim):
    def glorot(k, fan_in, fan_out):
        limit = np.sqrt(6.0 / (fan_in + fan_out))
        return jax.random.uniform(k, (fan_in, fan_out), jnp.float32, -limit, limit)

    k1, k2, k3, k4 = jax.random.split(key, 4)
    half = hidden_dim // 2
    return (glorot(k1, input_dim, hidden_dim), jnp.zeros((1, hidden_dim), jnp.float32),
            glorot(k2, hidden_dim, hidden_dim), jnp.zeros((1, hidden_dim), jnp.float32),
            glorot(k3, hidden_dim, half), jnp.zeros((1, half), jnp.float32),
            glorot(k4, half, output_dim), jnp.zeros((1, output_dim), jnp.float32))


def reference_forward(a_hat, x, params, batch, num_graphs):
    """Pure-JAX f32 reference of the module's forward()."""
    w1, b1, w2, b2, w3, b3, w4, b4 = params
    h1 = jnp.maximum(a_hat @ (x @ w1) + b1, 0.0)
    h2 = a_hat @ (h1 @ w2) + b2
    one_hot = (batch[None, :] == jnp.arange(num_graphs)[:, None]).astype(jnp.float32)
    g = (one_hot @ h2) / jnp.maximum(one_hot.sum(axis=1, keepdims=True), 1.0)
    z = jnp.maximum(g @ w3 + b3, 0.0)
    return z @ w4 + b4


if __name__ == "__main__":
    # Small synthetic graph batch: 2 graphs x 8 nodes = 16 nodes total.
    input_dim, hidden_dim, output_dim = 8, 32, 102
    nodes_per_graph, num_graphs = 8, 2
    num_nodes = nodes_per_graph * num_graphs

    key = jax.random.PRNGKey(0)
    k_x, k_p = jax.random.split(key)

    x = jax.random.normal(k_x, (num_nodes, input_dim), jnp.float32)

    # Chain edges inside each graph (undirected: both directions).
    src, dst = [], []
    for gi in range(num_graphs):
        base = gi * nodes_per_graph
        for i in range(nodes_per_graph - 1):
            src += [base + i, base + i + 1]
            dst += [base + i + 1, base + i]
    edge_index = np.array([src, dst], dtype=np.int64)
    batch = np.repeat(np.arange(num_graphs), nodes_per_graph)

    a_hat = jnp.asarray(build_normalized_adjacency(edge_index, num_nodes))
    pool_mask, counts = build_pool_mask(batch, num_graphs)
    params = init_params(k_p, input_dim, hidden_dim, output_dim)

    out = image_gcn_forward(a_hat, x, params,
                            jnp.asarray(pool_mask), jnp.asarray(counts))
    out = jax.block_until_ready(out)

    ref = reference_forward(a_hat, x, params, jnp.asarray(batch), num_graphs)

    assert out.shape == (num_graphs, output_dim)
    assert bool(jnp.all(jnp.isfinite(out)))
    # bf16 matmul inputs, f32 accumulation -> loose tolerance vs f32 reference
    assert bool(jnp.allclose(out, ref, rtol=1e-1, atol=1e-1)), \
        float(jnp.max(jnp.abs(out - ref)))
    print("KERNEL_OK")
</pallas_src>

<mosaic_0001>
module attributes {stable_mosaic.version = 11 : i64} {
  func.func @_proj_kernel(%arg0: i32, %arg1: memref<128x128xbf16, #tpu.memory_space<vmem>>, %arg2: memref<128x128xbf16, #tpu.memory_space<vmem>>, %arg3: memref<128x128xbf16, #tpu.memory_space<vmem>>) attributes {dimension_semantics = [#tpu.dimension_semantics<parallel>], iteration_bounds = array<i64: 1>, scalar_prefetch = 0 : i64, scratch_operands = 0 : i64, tpu.core_type = #tpu.core_type<tc>, window_params = [{transform_indices = @transform_0, window_bounds = array<i64: 128, 128>}, {pipeline_mode = #tpu.pipeline_mode<synchronous>, transform_indices = @transform_1, window_bounds = array<i64: 128, 128>}, {transform_indices = @transform_2, window_bounds = array<i64: 128, 128>}]} {
    %c0 = arith.constant 0 : index
    %c0_0 = arith.constant 0 : index
    %0 = vector.load %arg1[%c0, %c0_0] : memref<128x128xbf16, #tpu.memory_space<vmem>>, vector<128x128xbf16>
    %c0_1 = arith.constant 0 : index
    %c0_2 = arith.constant 0 : index
    %1 = vector.load %arg2[%c0_1, %c0_2] : memref<128x128xbf16, #tpu.memory_space<vmem>>, vector<128x128xbf16>
    %cst = arith.constant dense<0.000000e+00> : vector<128x128xf32>
    %2 = tpu.matmul %0, %1, %cst {dimension_numbers = #tpu.dot_dimension_numbers<[1], [0], [0], [1], [0, 0, 1, 1], [], []>} : vector<128x128xbf16>, vector<128x128xbf16>, vector<128x128xf32> -> vector<128x128xf32>
    %3 = arith.truncf %2 : vector<128x128xf32> to vector<128x128xbf16>
    %c0_3 = arith.constant 0 : index
    %c0_4 = arith.constant 0 : index
    %4 = vector.load %arg3[%c0_3, %c0_4] : memref<128x128xbf16, #tpu.memory_space<vmem>>, vector<128x128xbf16>
    tpu.vector_store %arg3[%c0_3, %c0_4], %3 {strides = array<i32>} : memref<128x128xbf16, #tpu.memory_space<vmem>>, vector<128x128xbf16>,
    return
  }
  func.func @transform_0(%arg0: i32) -> (i32, i32) {
    %c0_i32 = arith.constant 0 : i32
    %c0_i32_0 = arith.constant 0 : i32
    return %arg0, %c0_i32 : i32, i32
  }
  func.func @transform_1(%arg0: i32) -> (i32, i32) {
    %c0_i32 = arith.constant 0 : i32
    %c0_i32_0 = arith.constant 0 : i32
    %c0_i32_1 = arith.constant 0 : i32
    return %c0_i32, %c0_i32_0 : i32, i32
  }
  func.func @transform_2(%arg0: i32) -> (i32, i32) {
    %c0_i32 = arith.constant 0 : i32
    %c0_i32_0 = arith.constant 0 : i32
    return %arg0, %c0_i32 : i32, i32
  }
}

</mosaic_0001>

<bundles_post_ra>
// kernel: tpu_custom_call.1
= control target key start
LH: loop header
LB: loop body
LE: loop exit
PB: predicated region body
PF: predicated region fallthrough
CT: control target
= control target key end

     0   :  { %7 = vsyncpa [#allocation3], 0  ;;  %s545_s0 = inlined_call_operand.hbm [shape: bf16[128,128], index: 0, kind: input, shape index: {}]   ;;  %s546_s1 = inlined_call_operand.hbm [shape: bf16[128,128], index: 1, kind: input, shape index: {}]   ;;  %s547_s2 = inlined_call_operand.hbm [shape: bf16[128,128], index: 2, kind: output, shape index: {}]  }
   0x1   :  { %8 = vsyncpa [#allocation6], 0 }
   0x2   :  { %9 = vsyncpa [#allocation4], 0  ;;  %s14_s11 = sshll.u32 %s545_s0, 4  ;;  %s507_s12 = smov [#allocation2]   ;;  %s15_s11 = int_to_ptr.hbm [resolvable:$true] %s14_s11 }
   0x3   :  { %s16_s13 = sshll.u32 %s507_s12, 4  ;;  %s27_s16 = sshll.u32 %s546_s1, 4  ;;  %s17_s13 = int_to_ptr.vmem [resolvable:$true] %s16_s13  ;;  %s28_s16 = int_to_ptr.hbm [resolvable:$true] %s27_s16 }
   0x4   :  { %s508_s17 = smov 64   ;;  %s509_s18 = smov 4  }
   0x5   :  { %22 = dma.hbm_to_vmem [thread:$0]  %s15_s11, 1024, %s17_s13, [#allocation3], %s508_s17, %s508_s17, %s509_s18  }
   0x6   :  { %s510_s19 = smov [#allocation5]  }
   0x7   :  { %s29_s20 = sshll.u32 %s510_s19, 4  ;;  %s30_s20 = int_to_ptr.vmem [resolvable:$true] %s29_s20 }
   0x8   :  { %35 = dma.hbm_to_vmem [thread:$0]  %s28_s16, 1024, %s30_s20, [#allocation6], %s508_s17, %s508_s17, %s509_s18  }
   0x9   :  { %501 = dma.done.wait [#allocation3], 1024  }
   0xa   :  { %502 = vsyncadd [#allocation3], 4294966272 }
   0xb   :  { %503 = dma.done.wait [#allocation6], 1024  }
   0xc   :  { %504 = vsyncadd [#allocation6], 4294966272  ;;  %v352_v0 = vld [vmem:[#allocation5 + $0x38] sm:$0xff]  ;;  %v351_v1 = vld [vmem:[#allocation5 + $0x30] sm:$0xff]  ;;  %s511_s0 = smov [#allocation7]   ;;  %s259_s23 = sshll.u32 %s547_s2, 4  ;;  %s260_s23 = int_to_ptr.hbm [resolvable:$true] %s259_s23 }
   0xd   :  { %172 = vmatpush.bf16.msra.mxu0 %v352_v0  ;;  %400 = vmatpush.bf16.msra.mxu1 %v352_v0  ;;  %v350_v2 = vld [vmem:[#allocation5 + $0x28] sm:$0xff]  ;;  %v349_v3 = vld [vmem:[#allocation5 + $0x20] sm:$0xff]  ;;  %v348_v4 = vld [vmem:[#allocation5 + $0x18] sm:$0xff]  ;;  %s257_s1 = sshll.u32 %s511_s0, 4  ;;  %s258_s1 = int_to_ptr.vmem [resolvable:$true] %s257_s1 }
   0xe   :  { %401 = vmatpush.bf16.msra.mxu2 %v352_v0  ;;  %402 = vmatpush.bf16.msra.mxu3 %v352_v0  ;;  %v347_v5 = vld [vmem:[#allocation5 + $0x10] sm:$0xff]  ;;  %v346_v6 = vld [vmem:[#allocation5 + $0x8] sm:$0xff]  ;;  %v345_v7 = vld [vmem:[#allocation5] sm:$0xff] }
   0xf   :  { %v337_v8 = vld [vmem:[#allocation2] sm:$0xff]  ;;  %v339_v9 = vld [vmem:[#allocation2 + $0x10] sm:$0xff]  ;;  %v338_v12 = vld [vmem:[#allocation2 + $0x8] sm:$0xff] }
  0x10   :  { %v341_v10 = vld [vmem:[#allocation2 + $0x20] sm:$0xff]  ;;  %v343_v11 = vld [vmem:[#allocation2 + $0x30] sm:$0xff]  ;;  %v340_v13 = vld [vmem:[#allocation2 + $0x18] sm:$0xff] }
  0x11   :  { %173 = vmatpush.bf16.msra.mxu0 %v351_v1  ;;  %403 = vmatpush.bf16.msra.mxu1 %v351_v1  ;;  %v342_v14 = vld [vmem:[#allocation2 + $0x28] sm:$0xff]  ;;  %v344_v15 = vld [vmem:[#allocation2 + $0x38] sm:$0xff] }
  0x12   :  { %404 = vmatpush.bf16.msra.mxu2 %v351_v1  ;;  %405 = vmatpush.bf16.msra.mxu3 %v351_v1 }
  0x15   :  { %174 = vmatpush.bf16.msra.mxu0 %v350_v2  ;;  %406 = vmatpush.bf16.msra.mxu1 %v350_v2 }
  0x16   :  { %407 = vmatpush.bf16.msra.mxu2 %v350_v2  ;;  %408 = vmatpush.bf16.msra.mxu3 %v350_v2 }
  0x19   :  { %175 = vmatpush.bf16.msra.mxu0 %v349_v3  ;;  %409 = vmatpush.bf16.msra.mxu1 %v349_v3 }
  0x1a   :  { %410 = vmatpush.bf16.msra.mxu2 %v349_v3  ;;  %411 = vmatpush.bf16.msra.mxu3 %v349_v3 }
  0x1d   :  { %176 = vmatpush.bf16.msra.mxu0 %v348_v4  ;;  %412 = vmatpush.bf16.msra.mxu1 %v348_v4 }
  0x1e   :  { %413 = vmatpush.bf16.msra.mxu2 %v348_v4  ;;  %414 = vmatpush.bf16.msra.mxu3 %v348_v4 }
  0x21   :  { %177 = vmatpush.bf16.msra.mxu0 %v347_v5  ;;  %415 = vmatpush.bf16.msra.mxu1 %v347_v5 }
  0x22   :  { %416 = vmatpush.bf16.msra.mxu2 %v347_v5  ;;  %417 = vmatpush.bf16.msra.mxu3 %v347_v5 }
  0x25   :  { %178 = vmatpush.bf16.msra.mxu0 %v346_v6  ;;  %418 = vmatpush.bf16.msra.mxu1 %v346_v6 }
  0x26   :  { %419 = vmatpush.bf16.msra.mxu2 %v346_v6  ;;  %420 = vmatpush.bf16.msra.mxu3 %v346_v6 }
  0x29   :  { %179 = vmatpush.bf16.msra.mxu0 %v345_v7  ;;  %421 = vmatpush.bf16.msra.mxu1 %v345_v7 }
  0x2a   :  { %422 = vmatpush.bf16.msra.mxu2 %v345_v7  ;;  %423 = vmatpush.bf16.msra.mxu3 %v345_v7 }
  0x2c   :  { %180 = vmatmul.bf16.vlgmr.msra.gmra.mxu0 %v337_v8  ;;  %190 = vmatmul.bf16.vlgmr.msra.gmra.mxu1 %v339_v9 }
  0x2d   :  { %200 = vmatmul.bf16.vlgmr.msra.gmra.mxu2 %v341_v10  ;;  %210 = vmatmul.bf16.vlgmr.msra.gmra.mxu3 %v343_v11 }
  0x3c   :  { %185 = vmatmul.bf16.gmra.mxu0 %v338_v12  ;;  %195 = vmatmul.bf16.gmra.mxu1 %v340_v13 }
  0x3d   :  { %205 = vmatmul.bf16.gmra.mxu2 %v342_v14  ;;  %215 = vmatmul.bf16.gmra.mxu3 %v344_v15 }
  0xa9   :  { %v181_v16 = vpop.f32.mrf.mxu0  ;;  %v191_v17 = vpop.f32.mrf.mxu1 }
  0xb0   :  { %v201_v18 = vpop.f32.mrf.mxu2  ;;  %v211_v19 = vpop.f32.mrf.mxu3 }
  0xb1   :  { %v183_v20 = vpop.f32.mrf.mxu0  ;;  %v193_v21 = vpop.f32.mrf.mxu1 }
  0xb2   :  { %v356_v22 = vpack.c.bf16 %v183_v20, %v181_v16  ;;  %v366_v23 = vpack.c.bf16 %v193_v21, %v191_v17 }
  0xb4   :  { %357 = vst [vmem:[#allocation7] sm:$0xff] %v356_v22  }
  0xb5   :  { %394 = vst [vmem:[#allocation7 + $0x10] sm:$0xff] %v366_v23  }
  0xb8   :  { %v203_v24 = vpop.f32.mrf.mxu2  ;;  %v213_v25 = vpop.f32.mrf.mxu3 }
  0xb9   :  { %v376_v26 = vpack.c.bf16 %v203_v24, %v201_v18  ;;  %v386_v27 = vpack.c.bf16 %v213_v25, %v211_v19  ;;  %v186_v28 = vpop.f32.mrf.mxu0  ;;  %v196_v29 = vpop.f32.mrf.mxu1 }
  0xbb   :  { %396 = vst [vmem:[#allocation7 + $0x20] sm:$0xff] %v376_v26  }
  0xbc   :  { %398 = vst [vmem:[#allocation7 + $0x30] sm:$0xff] %v386_v27  }
  0xc0   :  { %v206_v30 = vpop.f32.mrf.mxu2  ;;  %v216_v31 = vpop.f32.mrf.mxu3 }
  0xc1   :  { %v188_v32 = vpop.f32.mrf.mxu0  ;;  %v198_v33 = vpop.f32.mrf.mxu1 }
  0xc2   :  { %v361_v34 = vpack.c.bf16 %v188_v32, %v186_v28  ;;  %v371_v35 = vpack.c.bf16 %v198_v33, %v196_v29 }
  0xc4   :  { %393 = vst [vmem:[#allocation7 + $0x8] sm:$0xff] %v361_v34  }
  0xc5   :  { %395 = vst [vmem:[#allocation7 + $0x18] sm:$0xff] %v371_v35  }
  0xc8   :  { %v208_v36 = vpop.f32.mrf.mxu2  ;;  %v218_v37 = vpop.f32.mrf.mxu3 }
  0xc9   :  { %v381_v38 = vpack.c.bf16 %v208_v36, %v206_v30  ;;  %v391_v39 = vpack.c.bf16 %v218_v37, %v216_v31 }
  0xcb   :  { %397 = vst [vmem:[#allocation7 + $0x28] sm:$0xff] %v381_v38  }
  0xcc   :  { %399 = vst [vmem:[#allocation7 + $0x38] sm:$0xff] %v391_v39  }
  0xcd   :  { %265 = dma.vmem_to_hbm [thread:$0]  %s258_s1, 1024, %s260_s23, [#allocation4], %s508_s17, %s508_s17, %s509_s18  }
  0xce   :  { %505 = dma.done.wait [#allocation4], 1024  }
  0xcf   :  { %506 = vsyncadd [#allocation4], 4294966272 }
  0xd0   :  { %270 = vsyncpa [#allocation3], 1 }
  0xd1   :  { %271 = vsyncpa [#allocation6], 1 }
  0xd2   :  { %272 = vsyncpa [#allocation4], 1 }

</bundles_post_ra>
